<compile_context>
chip_gen: v5e
topology: v5e:2x2
jax: 0.10.0
libtpu: 0.0.40
codegen_flags: <defaults>
</compile_context>

<pallas_src>
import functools

import jax
import jax.numpy as jnp
import numpy as np
from jax import lax
from jax.experimental import pallas as pl
from jax.experimental.pallas import tpu as pltpu

LANES = 128
MAX_PIXELS_PER_BLOCK = 4096            # upper bound on rows_per_block * 128
VMEM_INPUT_BUDGET_BYTES = 8 * 1024 * 1024  # 2 inputs x 2 pipeline buffers


def _cdiv(a, b):
    return -(-a // b)


def _cps_kernel(strong_ref, weak_ref, sum1_ref, sum2_ref, *, hw, n_inner):
    sup = pl.program_id(1)          # parallel super-tile of row-blocks
    i = pl.program_id(2)            # reduction axis over row-blocks
    blk = sup * n_inner + i         # logical row-block index (may point past
                                    # the last real block; masked below)

    C, R, L = strong_ref.shape      # (classes, rows-per-block, 128)

    # ---- Pass 1: running class max + the logit picked at the *other*
    # branch's argmax, in the input's native dtype (max/compare/select are
    # exact in bf16).  Strict '>' preserves first-occurrence argmax tie-break.
    smax = strong_ref[0]
    wmax = weak_ref[0]
    s_at_wargmax = smax             # strong logit at argmax_c(weak)
    w_at_sargmax = wmax             # weak   logit at argmax_c(strong)
    for c in range(1, C):
        sc = strong_ref[c]
        wc = weak_ref[c]
        s_at_wargmax = jnp.where(wc > wmax, sc, s_at_wargmax)
        w_at_sargmax = jnp.where(sc > smax, wc, w_at_sargmax)
        smax = jnp.maximum(smax, sc)
        wmax = jnp.maximum(wmax, wc)

    smax_f = smax.astype(jnp.float32)
    wmax_f = wmax.astype(jnp.float32)

    # ---- Pass 2: exp-sums; only this path is upcast to f32.
    se = jnp.exp(strong_ref[0].astype(jnp.float32) - smax_f)
    we = jnp.exp(weak_ref[0].astype(jnp.float32) - wmax_f)
    for c in range(1, C):
        se = se + jnp.exp(strong_ref[c].astype(jnp.float32) - smax_f)
        we = we + jnp.exp(weak_ref[c].astype(jnp.float32) - wmax_f)

    # Per-pixel cross-entropy terms.
    ce1 = smax_f + jnp.log(se) - s_at_wargmax.astype(jnp.float32)  # CE(strong, argmax weak)
    ce2 = wmax_f + jnp.log(we) - w_at_sargmax.astype(jnp.float32)  # CE(weak,  argmax strong)

    # Mask only the per-pixel result with a select (NOT a multiply: garbage
    # edge lanes can be NaN/Inf).  Garbage stays lane-local because every
    # class reduction above is per-lane.
    row = lax.broadcasted_iota(jnp.int32, (R, L), 0)
    lane = lax.broadcasted_iota(jnp.int32, (R, L), 1)
    pix = blk * (R * L) + row * L + lane
    valid = pix < hw
    ce1 = jnp.where(valid, ce1, 0.0)
    ce2 = jnp.where(valid, ce2, 0.0)

    @pl.when(i == 0)
    def _():
        sum1_ref[...] = jnp.zeros_like(sum1_ref)
        sum2_ref[...] = jnp.zeros_like(sum2_ref)

    sum1_ref[...] += ce1
    sum2_ref[...] += ce2


def semi_loss_cps(strong_logits, weak_logits, loss_weight=1.0, ignore_index=255):
    """strong_logits, weak_logits: NCHW float arrays (f32 or bf16), same shape."""
    # TODO(synk): ignore_index is accepted but unused — pseudo-labels are argmax
    # outputs in [0, C) and the module assumes C < ignore_index, so no pixel is
    # ever ignored (avg_non_ignore reduces to a plain mean).
    N, C, H, W = strong_logits.shape
    HW = H * W
    itemsize = jnp.dtype(strong_logits.dtype).itemsize

    # (rows, 128) pixel layout.  Free reshape when HW % 128 == 0; otherwise a
    # one-time tail pad (masked in-kernel).
    rows = _cdiv(HW, LANES)
    hw_pad = rows * LANES
    s = strong_logits.reshape(N, C, HW)
    w = weak_logits.reshape(N, C, HW)
    if hw_pad != HW:
        pad = [(0, 0), (0, 0), (0, hw_pad - HW)]
        s = jnp.pad(s, pad)
        w = jnp.pad(w, pad)
    s = s.reshape(N, C, rows, LANES)
    w = w.reshape(N, C, rows, LANES)

    # Row-tile sized so the double-buffered input pipeline fits an 8 MiB VMEM
    # budget (safe under v5e's 16 MiB and v7x's 32 MiB scoped defaults).
    max_pixels = VMEM_INPUT_BUDGET_BYTES // (4 * C * itemsize)
    max_pixels = min(MAX_PIXELS_PER_BLOCK, max_pixels)
    rows_per_block = max(8, (max_pixels // LANES) // 8 * 8)   # multiple of 8
    if rows_per_block >= rows:
        rows_per_block = rows                                  # full extent
    num_row_blocks = _cdiv(rows, rows_per_block)

    # When N alone can't feed both v7x TensorCores, split row-blocks into two
    # parallel super-tiles (no-op on single-core chips).
    n_super = 2 if (N < 2 and num_row_blocks >= 2) else 1
    n_inner = _cdiv(num_row_blocks, n_super)
    last_block = num_row_blocks - 1

    def in_map(n, sup, i):
        # Clamp: a trailing (sup, i) combination past the last real block
        # re-reads the last block; its pixels are fully masked in-kernel.
        blk = jnp.minimum(sup * n_inner + i, last_block)
        return (n, 0, blk, 0)

    def out_map(n, sup, i):
        return (n, sup, 0, 0)

    kernel = functools.partial(_cps_kernel, hw=HW, n_inner=n_inner)

    flops = 14 * N * C * HW
    transcendentals = 2 * N * HW * (C + 1)          # exps + logs
    bytes_accessed = (2 * N * C * hw_pad * itemsize
                      + 2 * N * n_super * rows_per_block * LANES * 4)

    sum1, sum2 = pl.pallas_call(
        kernel,
        out_shape=(
            jax.ShapeDtypeStruct((N, n_super, rows_per_block, LANES), jnp.float32),
            jax.ShapeDtypeStruct((N, n_super, rows_per_block, LANES), jnp.float32),
        ),
        grid_spec=pltpu.PrefetchScalarGridSpec(
            num_scalar_prefetch=0,
            grid=(N, n_super, n_inner),
            in_specs=[
                pl.BlockSpec((pl.Squeezed(), C, rows_per_block, LANES), in_map),
                pl.BlockSpec((pl.Squeezed(), C, rows_per_block, LANES), in_map),
            ],
            out_specs=(
                pl.BlockSpec((pl.Squeezed(), pl.Squeezed(), rows_per_block, LANES), out_map),
                pl.BlockSpec((pl.Squeezed(), pl.Squeezed(), rows_per_block, LANES), out_map),
            ),
        ),
        compiler_params=pltpu.CompilerParams(
            dimension_semantics=("parallel", "parallel", "arbitrary")
        ),
        cost_estimate=pl.CostEstimate(
            flops=flops,
            transcendentals=transcendentals,
            bytes_accessed=bytes_accessed,
        ),
    )(s, w)

    # All pixels are non-ignored -> plain mean over N*H*W.
    P = N * HW
    loss1 = loss_weight * jnp.sum(sum1) / P
    loss2 = loss_weight * jnp.sum(sum2) / P
    return loss1 + loss2


def _reference(strong_logits, weak_logits, loss_weight=1.0):
    """Pure-JAX reference mirroring the PyTorch forward."""

    def ce(logits_nchw, targets_nhw):
        x = jnp.moveaxis(logits_nchw, 1, -1)  # NHWC
        logp = jax.nn.log_softmax(x, axis=-1)
        nll = -jnp.take_along_axis(logp, targets_nhw[..., None], axis=-1)[..., 0]
        return jnp.mean(nll)

    t_u = jnp.argmax(weak_logits, axis=1)
    t_u2 = jnp.argmax(strong_logits, axis=1)
    return (loss_weight * ce(strong_logits.astype(jnp.float32), t_u)
            + loss_weight * ce(weak_logits.astype(jnp.float32), t_u2))


if __name__ == "__main__":
    key = jax.random.PRNGKey(0)
    k1, k2, k3, k4 = jax.random.split(key, 4)

    # Small f32 check (HW multiple of 128, single row-block).
    N, C, H, W = 2, 4, 16, 16
    strong = jax.random.normal(k1, (N, C, H, W), dtype=jnp.float32)
    weak = jax.random.normal(k2, (N, C, H, W), dtype=jnp.float32)
    loss = jax.block_until_ready(semi_loss_cps(strong, weak))
    ref = _reference(strong, weak)
    np.testing.assert_allclose(np.asarray(loss), np.asarray(ref), rtol=1e-5, atol=1e-5)

    # bf16 check: HW not a multiple of 128 (tail pad + mask), N=1 (exercises
    # the second parallel super-tile axis), multiple row-blocks.
    N2, C2, H2, W2 = 1, 4, 70, 70
    strong2 = jax.random.normal(k3, (N2, C2, H2, W2), dtype=jnp.bfloat16)
    weak2 = jax.random.normal(k4, (N2, C2, H2, W2), dtype=jnp.bfloat16)
    loss2 = jax.block_until_ready(semi_loss_cps(strong2, weak2))
    ref2 = _reference(strong2, weak2)
    np.testing.assert_allclose(np.asarray(loss2), np.asarray(ref2), rtol=1e-4, atol=1e-4)

    print("KERNEL_OK")
</pallas_src>

<mosaic_0001>
module attributes {stable_mosaic.version = 11 : i64} {
  func.func @_cps_kernel(%arg0: i32, %arg1: i32, %arg2: i32, %arg3: memref<1x4x2x128xf32, #tpu.memory_space<vmem>>, %arg4: memref<1x4x2x128xf32, #tpu.memory_space<vmem>>, %arg5: memref<1x1x2x128xf32, #tpu.memory_space<vmem>>, %arg6: memref<1x1x2x128xf32, #tpu.memory_space<vmem>>) attributes {dimension_semantics = [#tpu.dimension_semantics<parallel>, #tpu.dimension_semantics<parallel>, #tpu.dimension_semantics<arbitrary>], iteration_bounds = array<i64: 2, 1, 1>, scalar_prefetch = 0 : i64, scratch_operands = 0 : i64, tpu.core_type = #tpu.core_type<tc>, window_params = [{transform_indices = @transform_0, window_bounds = array<i64: 1, 4, 2, 128>}, {transform_indices = @transform_1, window_bounds = array<i64: 1, 4, 2, 128>}, {transform_indices = @transform_2, window_bounds = array<i64: 1, 1, 2, 128>}, {transform_indices = @transform_3, window_bounds = array<i64: 1, 1, 2, 128>}]} {
    %c1_i32 = arith.constant 1 : i32
    %0 = arith.muli %arg1, %c1_i32 : i32
    %1 = arith.addi %0, %arg2 : i32
    %c0 = arith.constant 0 : index
    %c0_0 = arith.constant 0 : index
    %c0_1 = arith.constant 0 : index
    %c0_2 = arith.constant 0 : index
    %2 = vector.load %arg3[%c0, %c0_0, %c0_1, %c0_2] : memref<1x4x2x128xf32, #tpu.memory_space<vmem>>, vector<1x1x2x128xf32>
    %3 = vector.shape_cast %2 : vector<1x1x2x128xf32> to vector<2x128xf32>
    %c0_3 = arith.constant 0 : index
    %c0_4 = arith.constant 0 : index
    %c0_5 = arith.constant 0 : index
    %c0_6 = arith.constant 0 : index
    %4 = vector.load %arg4[%c0_3, %c0_4, %c0_5, %c0_6] : memref<1x4x2x128xf32, #tpu.memory_space<vmem>>, vector<1x1x2x128xf32>
    %5 = vector.shape_cast %4 : vector<1x1x2x128xf32> to vector<2x128xf32>
    %c0_7 = arith.constant 0 : index
    %c1 = arith.constant 1 : index
    %c0_8 = arith.constant 0 : index
    %c0_9 = arith.constant 0 : index
    %6 = vector.load %arg3[%c0_7, %c1, %c0_8, %c0_9] : memref<1x4x2x128xf32, #tpu.memory_space<vmem>>, vector<1x1x2x128xf32>
    %7 = vector.shape_cast %6 : vector<1x1x2x128xf32> to vector<2x128xf32>
    %c0_10 = arith.constant 0 : index
    %c1_11 = arith.constant 1 : index
    %c0_12 = arith.constant 0 : index
    %c0_13 = arith.constant 0 : index
    %8 = vector.load %arg4[%c0_10, %c1_11, %c0_12, %c0_13] : memref<1x4x2x128xf32, #tpu.memory_space<vmem>>, vector<1x1x2x128xf32>
    %9 = vector.shape_cast %8 : vector<1x1x2x128xf32> to vector<2x128xf32>
    %10 = arith.cmpf ogt, %9, %5 : vector<2x128xf32>
    %11 = arith.select %10, %7, %3 : vector<2x128xi1>, vector<2x128xf32>
    %12 = arith.cmpf ogt, %7, %3 : vector<2x128xf32>
    %13 = arith.select %12, %9, %5 : vector<2x128xi1>, vector<2x128xf32>
    %14 = arith.maximumf %3, %7 : vector<2x128xf32>
    %15 = arith.maximumf %5, %9 : vector<2x128xf32>
    %c0_14 = arith.constant 0 : index
    %c2 = arith.constant 2 : index
    %c0_15 = arith.constant 0 : index
    %c0_16 = arith.constant 0 : index
    %16 = vector.load %arg3[%c0_14, %c2, %c0_15, %c0_16] : memref<1x4x2x128xf32, #tpu.memory_space<vmem>>, vector<1x1x2x128xf32>
    %17 = vector.shape_cast %16 : vector<1x1x2x128xf32> to vector<2x128xf32>
    %c0_17 = arith.constant 0 : index
    %c2_18 = arith.constant 2 : index
    %c0_19 = arith.constant 0 : index
    %c0_20 = arith.constant 0 : index
    %18 = vector.load %arg4[%c0_17, %c2_18, %c0_19, %c0_20] : memref<1x4x2x128xf32, #tpu.memory_space<vmem>>, vector<1x1x2x128xf32>
    %19 = vector.shape_cast %18 : vector<1x1x2x128xf32> to vector<2x128xf32>
    %20 = arith.cmpf ogt, %19, %15 : vector<2x128xf32>
    %21 = arith.select %20, %17, %11 : vector<2x128xi1>, vector<2x128xf32>
    %22 = arith.cmpf ogt, %17, %14 : vector<2x128xf32>
    %23 = arith.select %22, %19, %13 : vector<2x128xi1>, vector<2x128xf32>
    %24 = arith.maximumf %14, %17 : vector<2x128xf32>
    %25 = arith.maximumf %15, %19 : vector<2x128xf32>
    %c0_21 = arith.constant 0 : index
    %c3 = arith.constant 3 : index
    %c0_22 = arith.constant 0 : index
    %c0_23 = arith.constant 0 : index
    %26 = vector.load %arg3[%c0_21, %c3, %c0_22, %c0_23] : memref<1x4x2x128xf32, #tpu.memory_space<vmem>>, vector<1x1x2x128xf32>
    %27 = vector.shape_cast %26 : vector<1x1x2x128xf32> to vector<2x128xf32>
    %c0_24 = arith.constant 0 : index
    %c3_25 = arith.constant 3 : index
    %c0_26 = arith.constant 0 : index
    %c0_27 = arith.constant 0 : index
    %28 = vector.load %arg4[%c0_24, %c3_25, %c0_26, %c0_27] : memref<1x4x2x128xf32, #tpu.memory_space<vmem>>, vector<1x1x2x128xf32>
    %29 = vector.shape_cast %28 : vector<1x1x2x128xf32> to vector<2x128xf32>
    %30 = arith.cmpf ogt, %29, %25 : vector<2x128xf32>
    %31 = arith.select %30, %27, %21 : vector<2x128xi1>, vector<2x128xf32>
    %32 = arith.cmpf ogt, %27, %24 : vector<2x128xf32>
    %33 = arith.select %32, %29, %23 : vector<2x128xi1>, vector<2x128xf32>
    %34 = arith.maximumf %24, %27 : vector<2x128xf32>
    %35 = arith.maximumf %25, %29 : vector<2x128xf32>
    %c0_28 = arith.constant 0 : index
    %c0_29 = arith.constant 0 : index
    %c0_30 = arith.constant 0 : index
    %c0_31 = arith.constant 0 : index
    %36 = vector.load %arg3[%c0_28, %c0_29, %c0_30, %c0_31] : memref<1x4x2x128xf32, #tpu.memory_space<vmem>>, vector<1x1x2x128xf32>
    %37 = vector.shape_cast %36 : vector<1x1x2x128xf32> to vector<2x128xf32>
    %38 = arith.subf %37, %34 : vector<2x128xf32>
    %39 = math.exp %38 : vector<2x128xf32>
    %c0_32 = arith.constant 0 : index
    %c0_33 = arith.constant 0 : index
    %c0_34 = arith.constant 0 : index
    %c0_35 = arith.constant 0 : index
    %40 = vector.load %arg4[%c0_32, %c0_33, %c0_34, %c0_35] : memref<1x4x2x128xf32, #tpu.memory_space<vmem>>, vector<1x1x2x128xf32>
    %41 = vector.shape_cast %40 : vector<1x1x2x128xf32> to vector<2x128xf32>
    %42 = arith.subf %41, %35 : vector<2x128xf32>
    %43 = math.exp %42 : vector<2x128xf32>
    %c0_36 = arith.constant 0 : index
    %c1_37 = arith.constant 1 : index
    %c0_38 = arith.constant 0 : index
    %c0_39 = arith.constant 0 : index
    %44 = vector.load %arg3[%c0_36, %c1_37, %c0_38, %c0_39] : memref<1x4x2x128xf32, #tpu.memory_space<vmem>>, vector<1x1x2x128xf32>
    %45 = vector.shape_cast %44 : vector<1x1x2x128xf32> to vector<2x128xf32>
    %46 = arith.subf %45, %34 : vector<2x128xf32>
    %47 = math.exp %46 : vector<2x128xf32>
    %48 = arith.addf %39, %47 : vector<2x128xf32>
    %c0_40 = arith.constant 0 : index
    %c1_41 = arith.constant 1 : index
    %c0_42 = arith.constant 0 : index
    %c0_43 = arith.constant 0 : index
    %49 = vector.load %arg4[%c0_40, %c1_41, %c0_42, %c0_43] : memref<1x4x2x128xf32, #tpu.memory_space<vmem>>, vector<1x1x2x128xf32>
    %50 = vector.shape_cast %49 : vector<1x1x2x128xf32> to vector<2x128xf32>
    %51 = arith.subf %50, %35 : vector<2x128xf32>
    %52 = math.exp %51 : vector<2x128xf32>
    %53 = arith.addf %43, %52 : vector<2x128xf32>
    %c0_44 = arith.constant 0 : index
    %c2_45 = arith.constant 2 : index
    %c0_46 = arith.constant 0 : index
    %c0_47 = arith.constant 0 : index
    %54 = vector.load %arg3[%c0_44, %c2_45, %c0_46, %c0_47] : memref<1x4x2x128xf32, #tpu.memory_space<vmem>>, vector<1x1x2x128xf32>
    %55 = vector.shape_cast %54 : vector<1x1x2x128xf32> to vector<2x128xf32>
    %56 = arith.subf %55, %34 : vector<2x128xf32>
    %57 = math.exp %56 : vector<2x128xf32>
    %58 = arith.addf %48, %57 : vector<2x128xf32>
    %c0_48 = arith.constant 0 : index
    %c2_49 = arith.constant 2 : index
    %c0_50 = arith.constant 0 : index
    %c0_51 = arith.constant 0 : index
    %59 = vector.load %arg4[%c0_48, %c2_49, %c0_50, %c0_51] : memref<1x4x2x128xf32, #tpu.memory_space<vmem>>, vector<1x1x2x128xf32>
    %60 = vector.shape_cast %59 : vector<1x1x2x128xf32> to vector<2x128xf32>
    %61 = arith.subf %60, %35 : vector<2x128xf32>
    %62 = math.exp %61 : vector<2x128xf32>
    %63 = arith.addf %53, %62 : vector<2x128xf32>
    %c0_52 = arith.constant 0 : index
    %c3_53 = arith.constant 3 : index
    %c0_54 = arith.constant 0 : index
    %c0_55 = arith.constant 0 : index
    %64 = vector.load %arg3[%c0_52, %c3_53, %c0_54, %c0_55] : memref<1x4x2x128xf32, #tpu.memory_space<vmem>>, vector<1x1x2x128xf32>
    %65 = vector.shape_cast %64 : vector<1x1x2x128xf32> to vector<2x128xf32>
    %66 = arith.subf %65, %34 : vector<2x128xf32>
    %67 = math.exp %66 : vector<2x128xf32>
    %68 = arith.addf %58, %67 : vector<2x128xf32>
    %c0_56 = arith.constant 0 : index
    %c3_57 = arith.constant 3 : index
    %c0_58 = arith.constant 0 : index
    %c0_59 = arith.constant 0 : index
    %69 = vector.load %arg4[%c0_56, %c3_57, %c0_58, %c0_59] : memref<1x4x2x128xf32, #tpu.memory_space<vmem>>, vector<1x1x2x128xf32>
    %70 = vector.shape_cast %69 : vector<1x1x2x128xf32> to vector<2x128xf32>
    %71 = arith.subf %70, %35 : vector<2x128xf32>
    %72 = math.exp %71 : vector<2x128xf32>
    %73 = arith.addf %63, %72 : vector<2x128xf32>
    %74 = math.log %68 : vector<2x128xf32>
    %75 = arith.addf %34, %74 : vector<2x128xf32>
    %76 = arith.subf %75, %31 : vector<2x128xf32>
    %77 = math.log %73 : vector<2x128xf32>
    %78 = arith.addf %35, %77 : vector<2x128xf32>
    %79 = arith.subf %78, %33 : vector<2x128xf32>
    %80 = tpu.iota {dimensions = array<i32: 0>} : vector<2x128xi32>
    %81 = tpu.iota {dimensions = array<i32: 1>} : vector<2x128xi32>
    %c256_i32 = arith.constant 256 : i32
    %82 = arith.muli %1, %c256_i32 : i32
    %c128_i32 = arith.constant 128 : i32
    %83 = vector.broadcast %c128_i32 : i32 to vector<2x128xi32>
    %84 = arith.muli %80, %83 : vector<2x128xi32>
    %85 = vector.broadcast %82 : i32 to vector<2x128xi32>
    %86 = arith.addi %85, %84 : vector<2x128xi32>
    %87 = arith.addi %86, %81 : vector<2x128xi32>
    %c256_i32_60 = arith.constant 256 : i32
    %88 = vector.broadcast %c256_i32_60 : i32 to vector<2x128xi32>
    %89 = arith.cmpi slt, %87, %88 : vector<2x128xi32>
    %cst = arith.constant 0.000000e+00 : f32
    %90 = vector.broadcast %cst : f32 to vector<2x128xf32>
    %91 = arith.select %89, %76, %90 : vector<2x128xi1>, vector<2x128xf32>
    %cst_61 = arith.constant 0.000000e+00 : f32
    %92 = vector.broadcast %cst_61 : f32 to vector<2x128xf32>
    %93 = arith.select %89, %79, %92 : vector<2x128xi1>, vector<2x128xf32>
    %c0_i32 = arith.constant 0 : i32
    %94 = arith.cmpi eq, %arg2, %c0_i32 : i32
    %95 = arith.extui %94 : i1 to i32
    %c0_i32_62 = arith.constant 0 : i32
    %96 = arith.cmpi ne, %95, %c0_i32_62 : i32
    scf.if %96 {
      %cst_79 = arith.constant 0.000000e+00 : f32
      %109 = vector.broadcast %cst_79 : f32 to vector<2x128xf32>
      %c0_80 = arith.constant 0 : index
      %c0_81 = arith.constant 0 : index
      %c0_82 = arith.constant 0 : index
      %c0_83 = arith.constant 0 : index
      %110 = vector.load %arg5[%c0_80, %c0_81, %c0_82, %c0_83] : memref<1x1x2x128xf32, #tpu.memory_space<vmem>>, vector<1x1x2x128xf32>
      %111 = vector.shape_cast %110 : vector<1x1x2x128xf32> to vector<2x128xf32>
      %112 = vector.shape_cast %109 : vector<2x128xf32> to vector<1x1x2x128xf32>
      tpu.vector_store %arg5[%c0_80, %c0_81, %c0_82, %c0_83], %112 {strides = array<i32>} : memref<1x1x2x128xf32, #tpu.memory_space<vmem>>, vector<1x1x2x128xf32>,
      %cst_84 = arith.constant 0.000000e+00 : f32
      %113 = vector.broadcast %cst_84 : f32 to vector<2x128xf32>
      %c0_85 = arith.constant 0 : index
      %c0_86 = arith.constant 0 : index
      %c0_87 = arith.constant 0 : index
      %c0_88 = arith.constant 0 : index
      %114 = vector.load %arg6[%c0_85, %c0_86, %c0_87, %c0_88] : memref<1x1x2x128xf32, #tpu.memory_space<vmem>>, vector<1x1x2x128xf32>
      %115 = vector.shape_cast %114 : vector<1x1x2x128xf32> to vector<2x128xf32>
      %116 = vector.shape_cast %113 : vector<2x128xf32> to vector<1x1x2x128xf32>
      tpu.vector_store %arg6[%c0_85, %c0_86, %c0_87, %c0_88], %116 {strides = array<i32>} : memref<1x1x2x128xf32, #tpu.memory_space<vmem>>, vector<1x1x2x128xf32>,
    } else {
    }
    %c0_63 = arith.constant 0 : index
    %c0_64 = arith.constant 0 : index
    %c0_65 = arith.constant 0 : index
    %c0_66 = arith.constant 0 : index
    %97 = vector.load %arg5[%c0_63, %c0_64, %c0_65, %c0_66] : memref<1x1x2x128xf32, #tpu.memory_space<vmem>>, vector<1x1x2x128xf32>
    %98 = vector.shape_cast %97 : vector<1x1x2x128xf32> to vector<2x128xf32>
    %99 = arith.addf %98, %91 : vector<2x128xf32>
    %c0_67 = arith.constant 0 : index
    %c0_68 = arith.constant 0 : index
    %c0_69 = arith.constant 0 : index
    %c0_70 = arith.constant 0 : index
    %100 = vector.load %arg5[%c0_67, %c0_68, %c0_69, %c0_70] : memref<1x1x2x128xf32, #tpu.memory_space<vmem>>, vector<1x1x2x128xf32>
    %101 = vector.shape_cast %100 : vector<1x1x2x128xf32> to vector<2x128xf32>
    %102 = vector.shape_cast %99 : vector<2x128xf32> to vector<1x1x2x128xf32>
    tpu.vector_store %arg5[%c0_67, %c0_68, %c0_69, %c0_70], %102 {strides = array<i32>} : memref<1x1x2x128xf32, #tpu.memory_space<vmem>>, vector<1x1x2x128xf32>,
    %c0_71 = arith.constant 0 : index
    %c0_72 = arith.constant 0 : index
    %c0_73 = arith.constant 0 : index
    %c0_74 = arith.constant 0 : index
    %103 = vector.load %arg6[%c0_71, %c0_72, %c0_73, %c0_74] : memref<1x1x2x128xf32, #tpu.memory_space<vmem>>, vector<1x1x2x128xf32>
    %104 = vector.shape_cast %103 : vector<1x1x2x128xf32> to vector<2x128xf32>
    %105 = arith.addf %104, %93 : vector<2x128xf32>
    %c0_75 = arith.constant 0 : index
    %c0_76 = arith.constant 0 : index
    %c0_77 = arith.constant 0 : index
    %c0_78 = arith.constant 0 : index
    %106 = vector.load %arg6[%c0_75, %c0_76, %c0_77, %c0_78] : memref<1x1x2x128xf32, #tpu.memory_space<vmem>>, vector<1x1x2x128xf32>
    %107 = vector.shape_cast %106 : vector<1x1x2x128xf32> to vector<2x128xf32>
    %108 = vector.shape_cast %105 : vector<2x128xf32> to vector<1x1x2x128xf32>
    tpu.vector_store %arg6[%c0_75, %c0_76, %c0_77, %c0_78], %108 {strides = array<i32>} : memref<1x1x2x128xf32, #tpu.memory_space<vmem>>, vector<1x1x2x128xf32>,
    return
  }
  func.func @transform_0(%arg0: i32, %arg1: i32, %arg2: i32) -> (i32, i32, i32, i32) {
    %c1_i32 = arith.constant 1 : i32
    %0 = arith.muli %arg1, %c1_i32 : i32
    %1 = arith.addi %0, %arg2 : i32
    %c0_i32 = arith.constant 0 : i32
    %2 = arith.minsi %1, %c0_i32 : i32
    %c0_i32_0 = arith.constant 0 : i32
    %c0_i32_1 = arith.constant 0 : i32
    %c0_i32_2 = arith.constant 0 : i32
    return %arg0, %c0_i32_0, %2, %c0_i32_1 : i32, i32, i32, i32
  }
  func.func @transform_1(%arg0: i32, %arg1: i32, %arg2: i32) -> (i32, i32, i32, i32) {
    %c1_i32 = arith.constant 1 : i32
    %0 = arith.muli %arg1, %c1_i32 : i32
    %1 = arith.addi %0, %arg2 : i32
    %c0_i32 = arith.constant 0 : i32
    %2 = arith.minsi %1, %c0_i32 : i32
    %c0_i32_0 = arith.constant 0 : i32
    %c0_i32_1 = arith.constant 0 : i32
    %c0_i32_2 = arith.constant 0 : i32
    return %arg0, %c0_i32_0, %2, %c0_i32_1 : i32, i32, i32, i32
  }
  func.func @transform_2(%arg0: i32, %arg1: i32, %arg2: i32) -> (i32, i32, i32, i32) {
    %c0_i32 = arith.constant 0 : i32
    %c0_i32_0 = arith.constant 0 : i32
    %c0_i32_1 = arith.constant 0 : i32
    return %arg0, %arg1, %c0_i32, %c0_i32_0 : i32, i32, i32, i32
  }
  func.func @transform_3(%arg0: i32, %arg1: i32, %arg2: i32) -> (i32, i32, i32, i32) {
    %c0_i32 = arith.constant 0 : i32
    %c0_i32_0 = arith.constant 0 : i32
    %c0_i32_1 = arith.constant 0 : i32
    return %arg0, %arg1, %c0_i32, %c0_i32_0 : i32, i32, i32, i32
  }
}

</mosaic_0001>

<bundles_post_ra>
// kernel: tpu_custom_call.1
= control target key start
LH: loop header
LB: loop body
LE: loop exit
PB: predicated region body
PF: predicated region fallthrough
CT: control target
= control target key end

     0   :  { %s1130_s0 = inlined_call_operand.hbm [shape: f32[2,4,2,128], index: 0, kind: input, shape index: {}]   ;;  %s1131_s1 = inlined_call_operand.hbm [shape: f32[2,4,2,128], index: 1, kind: input, shape index: {}]   ;;  %s1132_s2 = inlined_call_operand.hbm [shape: f32[2,1,2,128], index: 2, kind: output, shape index: {0}]   ;;  %s1133_s3 = inlined_call_operand.hbm [shape: f32[2,1,2,128], index: 3, kind: output, shape index: {1}]  }
   0x1   :  { %1134 = sst [smem:[#allocation14_spill]] %s1130_s0 }
   0x2   :  { %9 = vsyncpa [#allocation3], 0 }
   0x3   :  { %11 = vsyncpa [#allocation3 + $0x1], 0 }
   0x4   :  { %12 = vsyncpa [#allocation6], 0 }
   0x5   :  { %14 = vsyncpa [#allocation6 + $0x1], 0 }
   0x6   :  { %15 = vsyncpa [#allocation4], 0 }
   0x7   :  { %17 = vsyncpa [#allocation4 + $0x1], 0 }
   0x8   :  { %18 = vsyncpa [#allocation9], 0 }
   0x9   :  { %20 = vsyncpa [#allocation9 + $0x1], 0  ;;  %s899_s12 = smov 0   ;;  %s901_s13 = smov 0  }
   0xa   :  { %s903_s14 = smov 0   ;;  %s905_s15 = smov 0  }
   0xb   :  { %s907_s16 = smov 0   ;;  %s909_s17 = smov 0  }
   0xc LB: > { %s572_s18 = sadd.s32 4294967295, %s874_s17   ;;  %s573_s19 = sadd.s32 4294967294, %s874_s17   ;;  %s874_s17 = sphi %s909_s17, %s26_s17   ;;  %s870_s16 = sphi %s907_s16, %s1145_s16   ;;  %s866_s15 = sphi %s905_s15, %s1144_s15   ;;  %s862_s14 = sphi %s903_s14, %s1143_s14   ;;  %s858_s13 = sphi %s901_s13, %s1142_s13   ;;  %s854_s12 = sphi %s899_s12, %s1141_s12  }
   0xd   : > { %s45_s20 = sadd.s32 1, %s870_s16  ;;  %s60_s21 = sadd.s32 1, %s862_s14 }
   0xe   : > { %p47_p0 = scmp.ge.s32.totalorder %s45_s20, 2  ;;  %p67_p1 = scmp.ne.s32.totalorder %s862_s14, %s858_s13 }
   0xf   : > { %p68_p2 = scmp.eq.s32.totalorder %s874_s17, 0  ;;  %p73_p3 = scmp.ne.s32.totalorder %s858_s13, %s854_s12 }
  0x10   : > { %s1147_s20 = smov (%p47_p0, %s45_s20), 0  ;;  %p74_p5 = scmp.eq.s32.totalorder %s572_s18, 0 }
  0x11   : > { %p940_p4 = por %p68_p2, %p67_p1  ;;  %s55_s23 = ssub.s32 %s870_s16, %s1147_s20 }
  0x12   : > { %p133_p6 = scmp.eq.s32.totalorder %s572_s18, 1  ;;  %p58_p7 = scmp.eq.s32.totalorder %s55_s23, 0 }
  0x13   : > { %p946_p8 = por %p74_p5, %p73_p3  ;;  %p139_p10 = scmp.eq.s32.totalorder %s573_s19, 1 }
  0x14   : > { %p950_p9 = por %p133_p6, %p67_p1  ;;  %p575_p12 = scmp.ge.s32.totalorder %s874_s17, 2 }
  0x15   : > { %s955_s26 = scalar_select %p58_p7, %s862_s14, %s60_s21  }
  0x16   : > { %p957_p11 = por %p139_p10, %p73_p3  ;;  %p623_p13 = scmp.lt.s32.totalorder %s874_s17, 2 }
  0x17   : > { %s964_s28 = sand.u32 1, %s862_s14   ;;  %s599_s30 = sshll.u32 %s870_s16, 3 }
  0x18   : > { %s576_s29 = sshll.u32 %s964_s28, 3  ;;  %s1139_s0 = sld [smem:[#allocation14_spill]] }
  0x19   : > { %s191_s7 = scalar_lea.vmem [#allocation2], %s576_s29  ;;  %p973_p0 = pnand %p623_p13, %p940_p4 }
  0x1a   : > { %s203_s8 = sshll.u32 %s191_s7, 4  ;;  %p582_p1 = scmp.ge.s32.totalorder %s874_s17, 1  ;;  %s204_s8 = int_to_ptr.vmem [resolvable:$true] %s203_s8 }
  0x1b   : > { %s188_s11 = scalar_lea.sflag [#allocation3], %s964_s28  ;;  %s876_s18 = smov 32  }
  0x1c   : > { %s877_s19 = smov 2   ;;  %p237_p2 = scmp.lt.s32.totalorder %s874_s17, 3 }
  0x1d   : > { %s226_s4 = scalar_lea.hbm %s1131_s1, %s599_s30  ;;  %s217_s22 = scalar_lea.vmem [#allocation5], %s576_s29 }
  0x1e   : > { %s200_s6 = scalar_lea.hbm %s1139_s0, %s599_s30  ;;  %p238_p3 = pnand %p582_p1, %p237_p2 }
  0x1f   : > { %s201_s9 = sshll.u32 %s200_s6, 4  ;;  %s227_s5 = sshll.u32 %s226_s4, 4  ;;  %s202_s9 = int_to_ptr.hbm [resolvable:$true] %s201_s9  ;;  %s228_s5 = int_to_ptr.hbm [resolvable:$true] %s227_s5 }
  0x20   : > { %612 = dma.hbm_to_vmem [thread:$0]  (!%p973_p0), %s202_s9, 128, %s204_s8, %s188_s11, %s876_s18, %s876_s18, %s877_s19  }
  0x21   : > { %s229_s6 = sshll.u32 %s217_s22, 4  ;;  %s214_s7 = scalar_lea.sflag [#allocation6], %s964_s28  ;;  %s230_s6 = int_to_ptr.vmem [resolvable:$true] %s229_s6 }
  0x22   : > { %615 = dma.hbm_to_vmem [thread:$0]  (!%p973_p0), %s228_s5, 128, %s230_s6, %s214_s7, %s876_s18, %s876_s18, %s877_s19  }
  0x23   : > { %241 = sbr.rel (%p238_p3) target bundleno = 102 (0x66), region = 28  ;;  %s989_s0 = sand.u32 (!%p238_p3), 1, %s858_s13  }
  0x24   : > { %s583_s8 = sshll.u32 (!%p238_p3), %s989_s0, 3  ;;  %s244_s9 = scalar_lea.sflag (!%p238_p3), [#allocation3], %s989_s0 }
  0x25   : > { %s247_s11 = scalar_lea.vmem (!%p238_p3), [#allocation2], %s583_s8 }
  0x28   : > { %837 = dma.done.wait (%p946_p8), %s244_s9, 128  }
  0x29   : > { %839 = vsyncadd (%p946_p8), %s244_s9, 4294967168  ;;  %s254_s28 = scalar_lea.sflag [#allocation6], %s989_s0  ;;  %s257_s29 = scalar_lea.vmem [#allocation5], %s583_s8 }
  0x2a   : > { %841 = dma.done.wait (%p946_p8), %s254_s28, 128  }
  0x2b   : > { %843 = vsyncadd (%p946_p8), %s254_s28, 4294967168  ;;  %s585_s30 = sshll.u32 %s989_s0, 1  ;;  %v878_v0 = vmov 0.0   ;;  %v1009_v1 = vld [vmem:[%s247_s11] sm:$0x3]  ;;  %v368_v36 = vlaneseq  ;;  %s595_s24 = sshll.u32 %s866_s15, 1 }
  0x2c   : > { %s1003_s10 = scalar_lea.vmem [#allocation7], %s585_s30  ;;  %s1006_s18 = scalar_lea.vmem [#allocation8], %s585_s30  ;;  %v299_v2 = vld [vmem:[%s257_s29] sm:$0x3]  ;;  %v587_v3 = vld [vmem:[%s247_s11 + $0x2] sm:$0x3] }
  0x2d   : > { %384 = vst [vmem:[%s1003_s10] sm:$0x3] %v878_v0  ;;  %v588_v4 = vld [vmem:[%s257_s29 + $0x2] sm:$0x3]  ;;  %v1012_v5 = vmax.f32 %v1009_v1, %v587_v3  ;;  %v1014_v6 = vld [vmem:[%s247_s11 + $0x4] sm:$0x3]  ;;  %v369_v45 = vshrl.u32 %v368_v36, 7  ;;  %vm306_vm1 = vcmp.gt.f32.partialorder %v587_v3, %v1009_v1  ;;  %s409_s23 = scalar_lea.hbm %s1132_s2, %s595_s24  ;;  %s424_s5 = scalar_lea.hbm %s1133_s3, %s595_s24 }
  0x2e   : > { %385 = vst [vmem:[%s1006_s18] sm:$0x3] %v878_v0  ;;  %v1016_v7 = vld [vmem:[%s257_s29 + $0x4] sm:$0x3]  ;;  %v309_v8 = vmax.f32 %v299_v2, %v588_v4  ;;  %v1018_v9 = vld [vmem:[%s247_s11 + $0x6] sm:$0x3]  ;;  %vm304_vm0 = vcmp.gt.f32.partialorder %v588_v4, %v299_v2  ;;  %v371_v48 = vand.u32 127, %v368_v36  ;;  %v307_v50 = vsel %vm306_vm1, %v588_v4, %v299_v2 }
  0x2f   : > { %v1022_v10 = vmax.f32 %v1012_v5, %v1014_v6  ;;  %v1024_v11 = vld [vmem:[%s257_s29 + $0x6] sm:$0x3]  ;;  %v305_v47 = vsel %vm304_vm0, %v587_v3, %v1009_v1  ;;  %v373_v49 = vmul.u32 128, %v369_v45  ;;  %vm316_vm3 = vcmp.gt.f32.partialorder %v1014_v6, %v1012_v5  ;;  %s411_s22 = sshll.u32 %s1003_s10, 4  ;;  %s413_s6 = sshll.u32 %s409_s23, 4  ;;  %s412_s22 = int_to_ptr.vmem [resolvable:$true] %s411_s22  ;;  %s414_s6 = int_to_ptr.hbm [resolvable:$true] %s413_s6 }
  0x30   : > { %v1027_v12 = vmax.f32 %v309_v8, %v1016_v7  ;;  %vm314_vm2 = vcmp.gt.f32.partialorder %v1016_v7, %v309_v8  ;;  %v317_v54 = vsel %vm316_vm3, %v1016_v7, %v307_v50  ;;  %s426_s7 = sshll.u32 %s1006_s18, 4  ;;  %s428_s8 = sshll.u32 %s424_s5, 4  ;;  %s1076_s7 = int_to_ptr.vmem [resolvable:$true] %s426_s7  ;;  %s1078_s8 = int_to_ptr.hbm [resolvable:$true] %s428_s8 }
  0x31   : > { %v1031_v13 = vmax.f32 %v1022_v10, %v1018_v9  ;;  %v315_v51 = vsel %vm314_vm2, %v1014_v6, %v305_v47  ;;  %v376_v53 = vadd.s32 %v373_v49, %v371_v48  ;;  %vm326_vm5 = vcmp.gt.f32.partialorder %v1018_v9, %v1022_v10  ;;  %s393_s9 = scalar_lea.sflag [#allocation4], %s989_s0  ;;  %s770_s11 = sshra.s32 %s414_s6, 4  ;;  %s771_s11 = int_to_ptr.hbm [resolvable:$true] %s770_s11 }
  0x32   : > { %v1035_v14 = vmax.f32 %v1027_v12, %v1024_v11  ;;  %vm324_vm4 = vcmp.gt.f32.partialorder %v1024_v11, %v1027_v12  ;;  %v327_v60 = vsel %vm326_vm5, %v1024_v11, %v317_v54  ;;  %s772_s28 = scalar_lea.hbm %s771_s11, 2  ;;  %s776_s24 = scalar_lea.hbm %s1132_s2, 4 }
  0x33   : > { %v330_v15 = vsub.f32 %v1009_v1, %v1031_v13  ;;  %v336_v16 = vsub.f32 %v587_v3, %v1031_v13  ;;  %v344_v17 = vsub.f32 %v1014_v6, %v1031_v13  ;;  %v352_v23 = vsub.f32 %v1018_v9, %v1031_v13  ;;  %p773_p4 = scmp.ne.s32.totalorder %s771_s11, %s772_s28  ;;  %p777_p7 = scmp.lt.s32.totalorder %s771_s11, %s1132_s2 }
  0x34   : > { %v333_v18 = vsub.f32 %v299_v2, %v1035_v14  ;;  %v340_v19 = vsub.f32 %v588_v4, %v1035_v14  ;;  %v348_v20 = vsub.f32 %v1016_v7, %v1035_v14  ;;  %v356_v26 = vsub.f32 %v1024_v11, %v1035_v14  ;;  %v386_v63 = vld [vmem:[%s1003_s10] sm:$0x3]  ;;  %p778_p8 = scmp.lt.s32.totalorder %s776_s24, %s772_s28 }
  0x35   : > { %v331_v21 = vmul.f32 1.442695, %v330_v15  ;;  %v337_v22 = vmul.f32 1.442695, %v336_v16  ;;  %v345_v27 = vmul.f32 1.442695, %v344_v17  ;;  %v325_v57 = vsel %vm324_vm4, %v1018_v9, %v315_v51  ;;  %p774_p5 = pnand %p773_p4, %p950_p9 }
  0x36   : > { %v334_v24 = vmul.f32 1.442695, %v333_v18  ;;  %v341_v25 = vmul.f32 1.442695, %v340_v19  ;;  %v349_v28 = vmul.f32 1.442695, %v348_v20  ;;  %p779_p10 = por %p778_p8, %p777_p7 }
  0x37   : > { %676 = vpow2.f32 %v331_v21  ;;  %v353_v29 = vmul.f32 1.442695, %v352_v23  ;;  %v357_v30 = vmul.f32 1.442695, %v356_v26  ;;  %vm377_vm6 = vcmp.lt.s32.totalorder %v376_v53, 256  ;;  %p775_p6 = pneg %p774_p5 }
  0x38   : > { %678 = vpow2.f32 %v334_v24  ;;  %v389_v1 = vld [vmem:[%s1006_s18] sm:$0x3] }
  0x39   : > { %680 = vpow2.f32 %v337_v22  ;;  %p780_p13 = pnand %p779_p10, %p775_p6 }
  0x3a   : > { %682 = vpow2.f32 %v341_v25 }
  0x3b   : > { %684 = vpow2.f32 %v345_v27 }
  0x3c   : > { %686 = vpow2.f32 %v349_v28 }
  0x3d   : > { %v677_v31 = vpop.eup %676  ;;  %688 = vpow2.f32 %v353_v29 }
  0x3e   : > { %v679_v32 = vpop.eup %678  ;;  %690 = vpow2.f32 %v357_v30 }
  0x3f   : > { %v681_v33 = vpop.eup %680 }
  0x40   : > { %v683_v34 = vpop.eup %682  ;;  %v339_v35 = vadd.f32 %v681_v33, %v677_v31 }
  0x41   : > { %v685_v37 = vpop.eup %684  ;;  %v343_v38 = vadd.f32 %v683_v34, %v679_v32 }
  0x42   : > { %v687_v39 = vpop.eup %686  ;;  %v347_v40 = vadd.f32 %v685_v37, %v339_v35 }
  0x43   : > { %v689_v41 = vpop.eup %688  ;;  %v351_v42 = vadd.f32 %v687_v39, %v343_v38 }
  0x44   : > { %v691_v43 = vpop.eup %690  ;;  %v355_v44 = vadd.f32 %v689_v41, %v347_v40 }
  0x45   : > { %v359_v46 = vadd.f32 %v691_v43, %v351_v42 }
  0x46   : > { %692 = vlog2.f32 %v355_v44 }
  0x47   : > { %694 = vlog2.f32 %v359_v46 }
  0x4c   : > { %v693_v52 = vpop.eup %692 }
  0x4d   : > { %v695_v55 = vpop.eup %694  ;;  %v361_v56 = vmul.f32 0.6931472, %v693_v52 }
  0x4e   : > { %v365_v58 = vmul.f32 0.6931472, %v695_v55 }
  0x4f   : > { %v362_v59 = vadd.f32 %v361_v56, %v1031_v13 }
  0x50   : > { %v366_v61 = vadd.f32 %v365_v58, %v1035_v14 }
  0x51   : > { %v363_v62 = vsub.f32 %v362_v59, %v325_v57 }
  0x52   : > { %v367_v0 = vsub.f32 %v366_v61, %v327_v60 }
  0x53   : > { %v378_v2 = vsel %vm377_vm6, %v363_v62, 0.0 }
  0x54   : > { %v387_v3 = vadd.f32 %v386_v63, %v378_v2  ;;  %v379_v4 = vsel %vm377_vm6, %v367_v0, 0.0 }
  0x55   : > { %v390_v5 = vadd.f32 %v389_v1, %v379_v4 }
  0x56   : > { %388 = vst [vmem:[%s1003_s10] sm:$0x3] %v387_v3 }
  0x57   : > { %391 = vst [vmem:[%s1006_s18] sm:$0x3] %v390_v5 }
  0x58   : > { %783 = shalt.err (!%p780_p13)
}
  0x59   : > { %605 = dma.vmem_to_hbm [thread:$0]  (%p950_p9), %s412_s22, 32, %s414_s6, %s393_s9  }
  0x5a   : > { %s398_s10 = scalar_lea.sflag [#allocation9], %s989_s0  ;;  %s798_s18 = sshra.s32 %s1078_s8, 4  ;;  %s799_s18 = int_to_ptr.hbm [resolvable:$true] %s798_s18 }
  0x5b   : > { %s800_s23 = scalar_lea.hbm %s799_s18, 2  ;;  %s804_s5 = scalar_lea.hbm %s1133_s3, 4 }
  0x5c   : > { %p801_p0 = scmp.ne.s32.totalorder %s799_s18, %s800_s23  ;;  %p805_p3 = scmp.lt.s32.totalorder %s799_s18, %s1133_s3 }
  0x5d   : > { %p806_p4 = scmp.lt.s32.totalorder %s804_s5, %s800_s23 }
  0x5e   : > { %p802_p1 = pnand %p801_p0, %p950_p9 }
  0x5f   : > { %p807_p5 = por %p806_p4, %p805_p3 }
  0x60   : > { %p803_p2 = pneg %p802_p1 }
  0x62   : > { %p808_p6 = pnand %p807_p5, %p803_p2 }
  0x64   : > { %811 = shalt.err (!%p808_p6)
}
  0x65   : > { %606 = dma.vmem_to_hbm [thread:$0]  (%p950_p9), %s1076_s7, 32, %s1078_s8, %s398_s10  }
  0x66 PF: > { %s440_s0 = sand.u32 1, %s854_s12   ;;  %p617_p7 = pnand %p575_p12, %p957_p11 }
  0x67   : > { %s441_s22 = scalar_lea.sflag [#allocation4], %s440_s0 }
  0x68   : > { %p618_p8 = pneg %p617_p7 }
  0x6a   : > { %845 = dma.done.wait (%p618_p8), %s441_s22, 32  }
  0x6b   : > { %847 = vsyncadd (%p618_p8), %s441_s22, 4294967264  ;;  %s451_s6 = scalar_lea.sflag [#allocation9], %s440_s0 }
  0x6c   : > { %849 = dma.done.wait (%p618_p8), %s451_s6, 32  }
  0x6d   : > { %851 = vsyncadd (%p618_p8), %s451_s6, 4294967264  ;;  %s26_s17 = sadd.s32 1, %s874_s17   ;;  %s1141_s12 = smov %s858_s13 }
  0x6e   : > { %p23_p10 = scmp.ge.s32.totalorder %s26_s17, 4   ;;  %s1142_s13 = smov %s862_s14 }
  0x6f   : > { %s1143_s14 = smov %s955_s26  ;;  %s1144_s15 = smov %s870_s16 }
  0x70   : > { %s1145_s16 = smov %s1147_s20  ;;  %25 = sbr.rel (!%p23_p10) target bundleno = 12 (0xc), region = 113 }
  0x75   :  { %457 = vsyncpa [#allocation3], 1 }
  0x76   :  { %459 = vsyncpa [#allocation3 + $0x1], 1 }
  0x77   :  { %460 = vsyncpa [#allocation6], 1 }
  0x78   :  { %462 = vsyncpa [#allocation6 + $0x1], 1 }
  0x79   :  { %463 = vsyncpa [#allocation4], 1 }
  0x7a   :  { %465 = vsyncpa [#allocation4 + $0x1], 1 }
  0x7b   :  { %466 = vsyncpa [#allocation9], 1 }
  0x7c   :  { %468 = vsyncpa [#allocation9 + $0x1], 1 }

</bundles_post_ra>
